<compile_context>
chip_gen: v7x
topology: tpu7x:2x2x1
jax: 0.10.0
libtpu: 0.0.40
codegen_flags: <defaults>
</compile_context>

<pallas_src>
import functools
import math

import jax
import jax.numpy as jnp
from jax import lax
from jax.experimental import pallas as pl
from jax.experimental.pallas import tpu as pltpu


def _round_up(x, m):
    return ((x + m - 1) // m) * m


def self_attention_kernel(x_ref, wqkv_ref, o_ref, *, d_out_pad, true_d_out, true_seq):
    x = x_ref[...]                        # [S_pad, d_in_pad]
    wqkv = wqkv_ref[...]                  # [d_in_pad, 3*d_out_pad]

    # Single fused Q/K/V projection on the MXU, f32 accumulation.
    qkv = jnp.dot(x, wqkv, preferred_element_type=jnp.float32)  # [S_pad, 3*d_out_pad]

    # Fold the softmax scale into Q (uses the TRUE d_out, matching the module:
    # scores / keys.shape[-1] ** 0.5).
    scale = 1.0 / math.sqrt(float(true_d_out))
    q = qkv[:, :d_out_pad] * scale
    k = qkv[:, d_out_pad:2 * d_out_pad]
    v = qkv[:, 2 * d_out_pad:]

    # scores = Q @ K^T without materializing a transpose: contract last dims.
    scores = lax.dot_general(
        q, k,
        dimension_numbers=(((1,), (1,)), ((), ())),
        preferred_element_type=jnp.float32)                     # [S_pad, S_pad]

    # Mask padded key positions (zero-padded K rows give score 0, which would
    # otherwise steal softmax mass). One [1, S_pad] bias row, broadcast add.
    s_pad = scores.shape[-1]
    key_idx = lax.broadcasted_iota(jnp.int32, (1, s_pad), 1)
    key_bias = jnp.where(key_idx < true_seq, 0.0, -jnp.inf).astype(jnp.float32)
    scores = scores + key_bias

    # Numerically stable softmax; divide replaced by EUP reciprocal + 1 NR step.
    m = jnp.max(scores, axis=-1, keepdims=True)
    e = jnp.exp(scores - m)
    denom = jnp.sum(e, axis=-1, keepdims=True)
    inv = pl.reciprocal(denom, approx=True)
    inv = inv * (2.0 - denom * inv)       # Newton-Raphson -> ~f32-exact reciprocal
    w = e * inv                           # [S_pad, S_pad]

    # Context vectors.
    ctx = jnp.dot(w, v, preferred_element_type=jnp.float32)     # [S_pad, d_out_pad]
    o_ref[...] = ctx.astype(o_ref.dtype)


def self_attention_v1(x, w_query, w_key, w_value):
    S, d_in = x.shape
    d_out = w_query.shape[1]

    SUB, LANE = 8, 128
    s_pad = _round_up(S, SUB)
    d_in_pad = _round_up(d_in, LANE)
    d_out_pad = _round_up(d_out, LANE)

    # Zero-pad to lane/sublane-dense shapes. Zeros are inert for the matmuls;
    # padded keys are explicitly masked out of the softmax inside the kernel.
    x_p = jnp.pad(x, ((0, s_pad - S), (0, d_in_pad - d_in)))

    def pad_w(w):
        return jnp.pad(w, ((0, d_in_pad - d_in), (0, d_out_pad - d_out)))

    w_qkv = jnp.concatenate([pad_w(w_query), pad_w(w_key), pad_w(w_value)], axis=1)

    kernel = functools.partial(
        self_attention_kernel,
        d_out_pad=d_out_pad, true_d_out=d_out, true_seq=S)

    out_p = pl.pallas_call(
        kernel,
        out_shape=jax.ShapeDtypeStruct((s_pad, d_out_pad), x.dtype),
        grid=(1,),
        in_specs=[
            pl.BlockSpec((s_pad, d_in_pad), lambda i: (0, 0)),
            pl.BlockSpec((d_in_pad, 3 * d_out_pad), lambda i: (0, 0)),
        ],
        out_specs=pl.BlockSpec((s_pad, d_out_pad), lambda i: (0, 0)),
        compiler_params=pltpu.CompilerParams(
            dimension_semantics=("arbitrary",),
        ),
    )(x_p, w_qkv)

    return out_p[:S, :d_out]


def self_attention_ref(x, w_query, w_key, w_value):
    q = x @ w_query
    k = x @ w_key
    v = x @ w_value
    scores = q @ k.T
    w = jax.nn.softmax(scores / jnp.sqrt(jnp.float32(k.shape[-1])), axis=-1)
    return w @ v


if __name__ == "__main__":
    d_in = 8
    d_out = 8
    seq = 4

    key = jax.random.PRNGKey(0)
    kx, kq, kk, kv = jax.random.split(key, 4)

    # torch.rand -> uniform [0, 1)
    x = jax.random.uniform(kx, (seq, d_in), dtype=jnp.float32)
    w_query = jax.random.uniform(kq, (d_in, d_out), dtype=jnp.float32)
    w_key = jax.random.uniform(kk, (d_in, d_out), dtype=jnp.float32)
    w_value = jax.random.uniform(kv, (d_in, d_out), dtype=jnp.float32)

    out = jax.block_until_ready(self_attention_v1(x, w_query, w_key, w_value))
    ref = self_attention_ref(x, w_query, w_key, w_value)

    assert out.shape == (seq, d_out)
    assert jnp.allclose(out, ref, atol=1e-4, rtol=1e-4), float(jnp.max(jnp.abs(out - ref)))

    print("KERNEL_OK")
</pallas_src>

<mosaic_0001>
module attributes {stable_mosaic.version = 11 : i64} {
  func.func @self_attention_kernel(%arg0: i32, %arg1: memref<8x128xf32, #tpu.memory_space<vmem>>, %arg2: memref<128x384xf32, #tpu.memory_space<vmem>>, %arg3: memref<8x128xf32, #tpu.memory_space<vmem>>) attributes {dimension_semantics = [#tpu.dimension_semantics<arbitrary>], iteration_bounds = array<i64: 1>, scalar_prefetch = 0 : i64, scratch_operands = 0 : i64, tpu.core_type = #tpu.core_type<tc>, window_params = [{pipeline_mode = #tpu.pipeline_mode<synchronous>, transform_indices = @transform_0, window_bounds = array<i64: 8, 128>}, {pipeline_mode = #tpu.pipeline_mode<synchronous>, transform_indices = @transform_1, window_bounds = array<i64: 128, 384>}, {pipeline_mode = #tpu.pipeline_mode<synchronous>, transform_indices = @transform_2, window_bounds = array<i64: 8, 128>}]} {
    %c0 = arith.constant 0 : index
    %c0_0 = arith.constant 0 : index
    %0 = vector.load %arg1[%c0, %c0_0] : memref<8x128xf32, #tpu.memory_space<vmem>>, vector<8x128xf32>
    %c0_1 = arith.constant 0 : index
    %c0_2 = arith.constant 0 : index
    %1 = vector.load %arg2[%c0_1, %c0_2] : memref<128x384xf32, #tpu.memory_space<vmem>>, vector<128x384xf32>
    %cst = arith.constant dense<0.000000e+00> : vector<8x384xf32>
    %2 = tpu.matmul %0, %1, %cst {dimension_numbers = #tpu.dot_dimension_numbers<[1], [0], [0], [1], [0, 0, 1, 1], [], []>} : vector<8x128xf32>, vector<128x384xf32>, vector<8x384xf32> -> vector<8x384xf32>
    %3 = vector.extract_strided_slice %2 {offsets = [0, 0], sizes = [8, 128], strides = [1, 1]} : vector<8x384xf32> to vector<8x128xf32>
    %cst_3 = arith.constant 0.353553385 : f32
    %4 = vector.broadcast %cst_3 : f32 to vector<8x128xf32>
    %5 = arith.mulf %3, %4 : vector<8x128xf32>
    %6 = vector.extract_strided_slice %2 {offsets = [0, 128], sizes = [8, 128], strides = [1, 1]} : vector<8x384xf32> to vector<8x128xf32>
    %7 = vector.extract_strided_slice %2 {offsets = [0, 256], sizes = [8, 128], strides = [1, 1]} : vector<8x384xf32> to vector<8x128xf32>
    %cst_4 = arith.constant dense<0.000000e+00> : vector<8x8xf32>
    %8 = tpu.matmul %5, %6, %cst_4 {dimension_numbers = #tpu.dot_dimension_numbers<[1], [1], [0], [0], [0, 0, 1, 0], [], []>} : vector<8x128xf32>, vector<8x128xf32>, vector<8x8xf32> -> vector<8x8xf32>
    %9 = tpu.iota {dimensions = array<i32: 1>} : vector<1x8xi32>
    %c4_i32 = arith.constant 4 : i32
    %10 = vector.broadcast %c4_i32 : i32 to vector<1x8xi32>
    %11 = arith.cmpi slt, %9, %10 : vector<1x8xi32>
    %cst_5 = arith.constant 0.000000e+00 : f32
    %cst_6 = arith.constant 0xFF800000 : f32
    %12 = vector.broadcast %cst_5 : f32 to vector<1x8xf32>
    %13 = vector.broadcast %cst_6 : f32 to vector<1x8xf32>
    %14 = arith.select %11, %12, %13 : vector<1x8xi1>, vector<1x8xf32>
    %15 = vector.broadcast %14 : vector<1x8xf32> to vector<8x8xf32>
    %16 = arith.addf %8, %15 : vector<8x8xf32>
    %cst_7 = arith.constant dense<0xFF800000> : vector<8xf32>
    %17 = vector.multi_reduction <maximumf>, %16, %cst_7 [1] : vector<8x8xf32> to vector<8xf32>
    %18 = vector.shape_cast %17 : vector<8xf32> to vector<8x1xf32>
    %19 = vector.broadcast %18 : vector<8x1xf32> to vector<8x8xf32>
    %20 = arith.subf %16, %19 : vector<8x8xf32>
    %21 = math.exp %20 : vector<8x8xf32>
    %cst_8 = arith.constant dense<0.000000e+00> : vector<8xf32>
    %22 = vector.multi_reduction <add>, %21, %cst_8 [1] : vector<8x8xf32> to vector<8xf32>
    %23 = vector.shape_cast %22 : vector<8xf32> to vector<8x1xf32>
    %24 = tpu.reciprocal %23 {approx = true} : vector<8x1xf32> -> vector<8x1xf32>
    %25 = arith.mulf %23, %24 : vector<8x1xf32>
    %cst_9 = arith.constant 2.000000e+00 : f32
    %26 = vector.broadcast %cst_9 : f32 to vector<8x1xf32>
    %27 = arith.subf %26, %25 : vector<8x1xf32>
    %28 = arith.mulf %24, %27 : vector<8x1xf32>
    %29 = vector.broadcast %28 : vector<8x1xf32> to vector<8x8xf32>
    %30 = arith.mulf %21, %29 : vector<8x8xf32>
    %cst_10 = arith.constant dense<0.000000e+00> : vector<8x128xf32>
    %31 = tpu.matmul %30, %7, %cst_10 {dimension_numbers = #tpu.dot_dimension_numbers<[1], [0], [0], [1], [0, 0, 1, 1], [], []>} : vector<8x8xf32>, vector<8x128xf32>, vector<8x128xf32> -> vector<8x128xf32>
    %c0_11 = arith.constant 0 : index
    %c0_12 = arith.constant 0 : index
    %32 = vector.load %arg3[%c0_11, %c0_12] : memref<8x128xf32, #tpu.memory_space<vmem>>, vector<8x128xf32>
    tpu.vector_store %arg3[%c0_11, %c0_12], %31 {strides = array<i32>} : memref<8x128xf32, #tpu.memory_space<vmem>>, vector<8x128xf32>,
    return
  }
  func.func @transform_0(%arg0: i32) -> (i32, i32) {
    %c0_i32 = arith.constant 0 : i32
    %c0_i32_0 = arith.constant 0 : i32
    %c0_i32_1 = arith.constant 0 : i32
    return %c0_i32, %c0_i32_0 : i32, i32
  }
  func.func @transform_1(%arg0: i32) -> (i32, i32) {
    %c0_i32 = arith.constant 0 : i32
    %c0_i32_0 = arith.constant 0 : i32
    %c0_i32_1 = arith.constant 0 : i32
    return %c0_i32, %c0_i32_0 : i32, i32
  }
  func.func @transform_2(%arg0: i32) -> (i32, i32) {
    %c0_i32 = arith.constant 0 : i32
    %c0_i32_0 = arith.constant 0 : i32
    %c0_i32_1 = arith.constant 0 : i32
    return %c0_i32, %c0_i32_0 : i32, i32
  }
}

</mosaic_0001>

<bundles_post_ra>
// kernel: tpu_custom_call.1
= control target key start
LH: loop header
LB: loop body
LE: loop exit
PB: predicated region body
PF: predicated region fallthrough
CT: control target
= control target key end

     0   :  { %7 = vsyncpa [#allocation3], 0  ;;  %s695_s0 = inlined_call_operand.hbm [shape: f32[8,128], index: 0, kind: input, shape index: {}]   ;;  %s696_s1 = inlined_call_operand.hbm [shape: f32[128,384], index: 1, kind: input, shape index: {}]   ;;  %s697_s2 = inlined_call_operand.hbm [shape: f32[8,128], index: 2, kind: output, shape index: {}]  }
   0x1   :  { %8 = vsyncpa [#allocation6], 0 }
   0x2   :  { %9 = vsyncpa [#allocation4], 0  ;;  %s616_s9 = smov [#allocation2]   ;;  %s617_s11 = smov [#allocation5]  }
   0x3   :  { %s16_s10 = sshll.u32 %s616_s9, 4  ;;  %s25_s12 = sshll.u32 %s617_s11, 4  ;;  %s17_s10 = int_to_ptr.vmem [resolvable:$true] %s16_s10  ;;  %s640_s12 = int_to_ptr.vmem [resolvable:$true] %s25_s12 }
   0x4   :  { %s544_s15 = scalar_lea.hbm %s695_s0, 128 }
   0x5   :  { %p545_p0 = scmp.ne.s32.totalorder %s695_s0, %s544_s15  ;;  %p548_p1 = scmp.lt.u32.totalorder %s544_s15, %s695_s0 }
   0x7   :  { %p550_p2 = pnand %p548_p1, %p545_p0 }
   0x9   :  { %553 = shalt.err (!%p550_p2)
}
   0xa   :  { %s554_s20 = scalar_lea.vmem %s17_s10, 128  ;;  %p559_p4 = scmp.lt.s32.totalorder %s17_s10, %s17_s10 }
   0xb   :  { %p555_p3 = scmp.ne.s32.totalorder %s17_s10, %s554_s20  ;;  %p560_p5 = scmp.lt.s32.totalorder %s554_s20, %s554_s20 }
   0xd   :  { %p561_p6 = por %p560_p5, %p559_p4 }
   0xf   :  { %p562_p7 = pnand %p561_p6, %p555_p3 }
  0x11   :  { %565 = shalt.err (!%p562_p7)
}
  0x12   :  { %19 = dma.hbm_to_vmem [thread:$0]  %s695_s0, 128, %s17_s10, [#allocation3]  }
  0x13   :  { %s566_s25 = scalar_lea.hbm %s696_s1, 6144 }
  0x14   :  { %p567_p8 = scmp.ne.s32.totalorder %s696_s1, %s566_s25  ;;  %p570_p9 = scmp.lt.u32.totalorder %s566_s25, %s696_s1 }
  0x16   :  { %p572_p10 = pnand %p570_p9, %p567_p8 }
  0x18   :  { %575 = shalt.err (!%p572_p10)
}
  0x19   :  { %s576_s30 = scalar_lea.vmem %s640_s12, 6144  ;;  %p581_p12 = scmp.lt.s32.totalorder %s640_s12, %s640_s12 }
  0x1a   :  { %p577_p11 = scmp.ne.s32.totalorder %s640_s12, %s576_s30  ;;  %p582_p13 = scmp.lt.s32.totalorder %s576_s30, %s576_s30 }
  0x1c   :  { %p583_p0 = por %p582_p13, %p581_p12 }
  0x1e   :  { %p584_p1 = pnand %p583_p0, %p577_p11 }
  0x20   :  { %587 = shalt.err (!%p584_p1)
}
  0x21   :  { %s618_s0 = smov 384   ;;  %s619_s3 = smov 24  }
  0x22   :  { %31 = dma.hbm_to_vmem [thread:$0]  %s696_s1, 6144, %s640_s12, [#allocation6], %s618_s0, %s618_s0, %s619_s3  }
  0x23   :  { %610 = dma.done.wait [#allocation3], 128  }
  0x24   :  { %611 = vsyncadd [#allocation3], 4294967168 }
  0x25   :  { %612 = dma.done.wait [#allocation6], 6144  }
  0x26   :  { %613 = vsyncadd [#allocation6], 4294961152  ;;  %v620_v0 = vmov 0.0   ;;  %v40_v1 = vld [vmem:[#allocation5 + $0x8] sm:$0xff]  ;;  %v43_v2 = vld [vmem:[#allocation5 + $0x20] sm:$0xff]  ;;  %vm621_vm0 = vmmov 0  }
  0x27   :  { %151 = vmatprep.mubr.f32.mxu0 %v620_v0  ;;  %v39_v3 = vld [vmem:[#allocation5] sm:$0xff]  ;;  %v475_v4 = vpack.c.bf16 %v43_v2, %v40_v1  ;;  %v42_v5 = vld [vmem:[#allocation5 + $0x18] sm:$0xff]  ;;  %v49_v7 = vld [vmem:[#allocation5 + $0x50] sm:$0xff]  ;;  %462 = vmatprep.mubr.msk.f32.mxu1 %vm621_vm0, %v620_v0  ;;  %v622_v56 = vmov 0.0|0.0   ;;  %vm303_vm2 = vcmask 64512   ;;  %s624_s1 = smov [#allocation7]  }
  0x28   :  { %v46_v6 = vld [vmem:[#allocation5 + $0x38] sm:$0xff]  ;;  %v477_v8 = vpack.c.bf16 %v42_v5, %v39_v3  ;;  %v45_v10 = vld [vmem:[#allocation5 + $0x30] sm:$0xff]  ;;  %v48_v11 = vld [vmem:[#allocation5 + $0x48] sm:$0xff]  ;;  %507 = vmatprep.subr.bf16.mxu1 %v622_v56  ;;  %s398_s6 = sshll.u32 %s624_s1, 4  ;;  %s399_s6 = int_to_ptr.vmem [resolvable:$true] %s398_s6 }
  0x29   :  { %v479_v9 = vpack.c.bf16 %v49_v7, %v46_v6  ;;  %v52_v12 = vld [vmem:[#allocation5 + $0x68] sm:$0xff]  ;;  %476 = vmatprep.subr.bf16.mxu0 %v475_v4  ;;  %v55_v13 = vld [vmem:[#allocation5 + $0x80] sm:$0xff]  ;;  %v481_v14 = vpack.c.bf16 %v48_v11, %v45_v10  ;;  %v54_v17 = vld [vmem:[#allocation5 + $0x78] sm:$0xff]  ;;  %s588_s7 = scalar_lea.vmem %s399_s6, 128  ;;  %p593_p3 = scmp.lt.s32.totalorder %s399_s6, %s399_s6 }
  0x2a   :  { %478 = vmatpush1.bf16.msra.mxu0 %v477_v8  ;;  %v483_v15 = vpack.c.bf16 %v55_v13, %v52_v12  ;;  %v51_v16 = vld [vmem:[#allocation5 + $0x60] sm:$0xff]  ;;  %v58_v18 = vld [vmem:[#allocation5 + $0x98] sm:$0xff]  ;;  %v61_v19 = vld [vmem:[#allocation5 + $0xb0] sm:$0xff]  ;;  %p589_p2 = scmp.ne.s32.totalorder %s399_s6, %s588_s7  ;;  %p594_p4 = scmp.lt.s32.totalorder %s588_s7, %s588_s7 }
  0x2b   :  { %480 = vmatprep.subr.bf16.mxu0 %v479_v9  ;;  %v485_v20 = vpack.c.bf16 %v54_v17, %v51_v16  ;;  %v487_v21 = vpack.c.bf16 %v61_v19, %v58_v18  ;;  %v57_v22 = vld [vmem:[#allocation5 + $0x90] sm:$0xff]  ;;  %v60_v23 = vld [vmem:[#allocation5 + $0xa8] sm:$0xff]  ;;  %v67_v25 = vld [vmem:[#allocation5 + $0xe0] sm:$0xff]  ;;  %v623_v17 = vmov -inf  }
  0x2c   :  { %v64_v24 = vld [vmem:[#allocation5 + $0xc8] sm:$0xff]  ;;  %v489_v26 = vpack.c.bf16 %v60_v23, %v57_v22  ;;  %v63_v28 = vld [vmem:[#allocation5 + $0xc0] sm:$0xff]  ;;  %v66_v29 = vld [vmem:[#allocation5 + $0xd8] sm:$0xff]  ;;  %p595_p5 = por %p594_p4, %p593_p3 }
  0x2d   :  { %v491_v27 = vpack.c.bf16 %v67_v25, %v64_v24  ;;  %v70_v30 = vld [vmem:[#allocation5 + $0xf8] sm:$0xff]  ;;  %v73_v31 = vld [vmem:[#allocation5 + $0x110] sm:$0xff]  ;;  %v493_v32 = vpack.c.bf16 %v66_v29, %v63_v28  ;;  %v72_v35 = vld [vmem:[#allocation5 + $0x108] sm:$0xff] }
  0x2e   :  { %482 = vmatpush1.bf16.msra.mxu0 %v481_v14  ;;  %v495_v33 = vpack.c.bf16 %v73_v31, %v70_v30  ;;  %v69_v34 = vld [vmem:[#allocation5 + $0xf0] sm:$0xff]  ;;  %v76_v36 = vld [vmem:[#allocation5 + $0x128] sm:$0xff]  ;;  %v79_v37 = vld [vmem:[#allocation5 + $0x140] sm:$0xff]  ;;  %p596_p6 = pnand %p595_p5, %p589_p2 }
  0x2f   :  { %484 = vmatprep.subr.bf16.mxu0 %v483_v15  ;;  %v497_v38 = vpack.c.bf16 %v72_v35, %v69_v34  ;;  %v499_v39 = vpack.c.bf16 %v79_v37, %v76_v36  ;;  %v75_v40 = vld [vmem:[#allocation5 + $0x120] sm:$0xff]  ;;  %v78_v41 = vld [vmem:[#allocation5 + $0x138] sm:$0xff]  ;;  %v85_v43 = vld [vmem:[#allocation5 + $0x170] sm:$0xff]  ;;  %v229_v15 = vlaneseq }
  0x30   :  { %v82_v42 = vld [vmem:[#allocation5 + $0x158] sm:$0xff]  ;;  %v501_v44 = vpack.c.bf16 %v78_v41, %v75_v40  ;;  %v81_v46 = vld [vmem:[#allocation5 + $0x150] sm:$0xff]  ;;  %v84_v47 = vld [vmem:[#allocation5 + $0x168] sm:$0xff] }
  0x31   :  { %v503_v45 = vpack.c.bf16 %v85_v43, %v82_v42  ;;  %v505_v48 = vpack.c.bf16 %v84_v47, %v81_v46  ;;  %v38_v49 = vld [vmem:[#allocation2] sm:$0xff]  ;;  %v41_v53 = vld [vmem:[#allocation5 + $0x10] sm:$0xff]  ;;  %v44_v54 = vld [vmem:[#allocation5 + $0x28] sm:$0xff]  ;;  %v230_v16 = vand.u32 127, %v229_v15 }
  0x32   :  { %486 = vmatpush1.bf16.msra.mxu0 %v485_v20  ;;  %v47_v55 = vld [vmem:[#allocation5 + $0x40] sm:$0xff]  ;;  %v508_v57 = vpack.c.bf16 %v44_v54, %v41_v53  ;;  %v50_v58 = vld [vmem:[#allocation5 + $0x58] sm:$0xff]  ;;  %v53_v60 = vld [vmem:[#allocation5 + $0x70] sm:$0xff] }
  0x33   :  { %488 = vmatprep.subr.bf16.mxu0 %v487_v21  ;;  %v511_v59 = vpack.c.bf16 %v50_v58, %v47_v55  ;;  %v56_v61 = vld [vmem:[#allocation5 + $0x88] sm:$0xff]  ;;  %v59_v63 = vld [vmem:[#allocation5 + $0xa0] sm:$0xff]  ;;  %v62_v1 = vld [vmem:[#allocation5 + $0xb8] sm:$0xff]  ;;  %vm231_vm1 = vcmp.lt.s32.totalorder %v230_v16, 4 }
  0x34   :  { %509 = vmatpush3.bf16.msra.mxu1 %v508_v57  ;;  %v514_v62 = vpack.c.bf16 %v56_v61, %v53_v60  ;;  %v517_v2 = vpack.c.bf16 %v62_v1, %v59_v63  ;;  %v65_v3 = vld [vmem:[#allocation5 + $0xd0] sm:$0xff]  ;;  %v68_v4 = vld [vmem:[#allocation5 + $0xe8] sm:$0xff]  ;;  %v71_v6 = vld [vmem:[#allocation5 + $0x100] sm:$0xff]  ;;  %v232_v18 = vsel %vm231_vm1, 0.0, %v623_v17 }
  0x35   :  { %510 = vmatprep.subr.bf16.mxu1 %v622_v56  ;;  %v520_v5 = vpack.c.bf16 %v68_v4, %v65_v3  ;;  %v74_v7 = vld [vmem:[#allocation5 + $0x118] sm:$0xff]  ;;  %v77_v9 = vld [vmem:[#allocation5 + $0x130] sm:$0xff]  ;;  %v80_v10 = vld [vmem:[#allocation5 + $0x148] sm:$0xff] }
  0x36   :  { %490 = vmatpush1.bf16.msra.mxu0 %v489_v26  ;;  %v523_v8 = vpack.c.bf16 %v74_v7, %v71_v6  ;;  %v526_v11 = vpack.c.bf16 %v80_v10, %v77_v9  ;;  %v83_v12 = vld [vmem:[#allocation5 + $0x160] sm:$0xff]  ;;  %v86_v13 = vld [vmem:[#allocation5 + $0x178] sm:$0xff] }
  0x37   :  { %492 = vmatprep.subr.bf16.mxu0 %v491_v27  ;;  %v529_v14 = vpack.c.bf16 %v86_v13, %v83_v12 }
  0x38   :  { %512 = vmatpush3.bf16.msra.mxu1 %v511_v59 }
  0x39   :  { %513 = vmatprep.subr.bf16.mxu1 %v622_v56 }
  0x3a   :  { %494 = vmatpush1.bf16.msra.mxu0 %v493_v32 }
  0x3b   :  { %496 = vmatprep.subr.bf16.mxu0 %v495_v33 }
  0x3c   :  { %515 = vmatpush3.bf16.msra.mxu1 %v514_v62 }
  0x3d   :  { %516 = vmatprep.subr.bf16.mxu1 %v622_v56 }
  0x3e   :  { %498 = vmatpush1.bf16.msra.mxu0 %v497_v38 }
  0x3f   :  { %500 = vmatprep.subr.bf16.mxu0 %v499_v39 }
  0x40   :  { %518 = vmatpush3.bf16.msra.mxu1 %v517_v2 }
  0x41   :  { %519 = vmatprep.subr.bf16.mxu1 %v622_v56 }
  0x42   :  { %502 = vmatpush1.bf16.msra.mxu0 %v501_v44 }
  0x43   :  { %504 = vmatprep.subr.bf16.mxu0 %v503_v45 }
  0x44   :  { %521 = vmatpush3.bf16.msra.mxu1 %v520_v5 }
  0x45   :  { %522 = vmatprep.subr.bf16.mxu1 %v622_v56 }
  0x46   :  { %506 = vmatpush1.bf16.msra.mxu0 %v505_v48 }
  0x47   :  { %465 = vmatprep.subr.mxu0 %v620_v0 }
  0x48   :  { %524 = vmatpush3.bf16.msra.mxu1 %v523_v8 }
  0x49   :  { %152 = vmatmul.mubr.f32.vlgmr.msra.gmra.mrb[0].mxu0 %v38_v49  ;;  %525 = vmatprep.subr.bf16.mxu1 %v622_v56 }
  0x4a   :  { %467 = vmatprep.mubr.msk.f32.mxu0 %vm621_vm0, %v620_v0 }
  0x4c   :  { %527 = vmatpush3.bf16.msra.mxu1 %v526_v11 }
  0x4d   :  { %528 = vmatprep.subr.bf16.mxu1 %v622_v56 }
  0x50   :  { %530 = vmatpush3.bf16.msra.mxu1 %v529_v14 }
  0x51   :  { %470 = vmatprep.subr.mxu1 %v620_v0 }
  0x53   :  { %463 = vmatmul.mubr.f32.vlgmr.msra.gmra.mrb[0].mxu1 %v38_v49 }
  0x54   :  { %472 = vmatprep.mubr.msk.f32.mxu1 %vm621_vm0, %v620_v0 }
 0x11c   :  { %v153_v50 = vpop.f32.mrb[0].mxu0 }
 0x11d   :  { %v155_v51 = vpop.f32.mrb[1].mxu0  ;;  %v228_v52 = vmul.f32 0.35355338, %v153_v50 }
 0x11e   :  { %466 = vmatpush3.xpose.msra.mxu0 %v155_v51 }
 0x121   :  { %468 = vmatmul.mubr.f32.vlgmr.msra.gmra.mrb[2].mxu0 %v228_v52 }
 0x126   :  { %v224_v0 = vpop.f32.mrb[0].mxu1 }
 0x127   :  { %v464_v28 = vpop.f32.mrb[1].mxu1  ;;  %471 = vmatpush3.msra.mxu1 %v224_v0 }
 0x1f4   :  { %v299_v19 = vpop.f32.mrb[2].mxu0 }
 0x1f5   :  { %v300_v20 = vadd.f32 %v299_v19, %v232_v18  ;;  %v469_v21 = vpop.f32.mrb[3].mxu0 }
 0x1f7   :  { %v304_v22 = vsel %vm303_vm2, %v300_v20, -inf }
 0x1f8   :  { %305 = vmax.xlane.f32.xlu0 %v304_v22 }
 0x285   :  { %v306_v23 = vpop.xlane.xlu0 %305 }
 0x286   :  { %v307_v24 = vsub.f32 %v300_v20, %v306_v23 }
 0x288   :  { %v308_v25 = vmul.f32 1.442695, %v307_v24 }
 0x28a   :  { %540 = vpow2.f32 %v308_v25 }
 0x294   :  { %v541_v26 = vpop.eup %540 }
 0x295   :  { %v310_v27 = vsel %vm303_vm2, %v541_v26, 0.0 }
 0x296   :  { %311 = vadd.xlane.f32.xlu0 %v310_v27 }
 0x323   :  { %v312_v29 = vpop.xlane.xlu0 %311 }
 0x324   :  { %542 = vrcp.f32 %v312_v29 }
 0x32e   :  { %v543_v30 = vpop.eup %542 }
 0x32f   :  { %v314_v31 = vmul.f32 %v543_v30, %v312_v29 }
 0x331   :  { %v315_v32 = vsub.f32 2.0, %v314_v31 }
 0x333   :  { %v316_v33 = vmul.f32 %v543_v30, %v315_v32 }
 0x335   :  { %v317_v34 = vmul.f32 %v541_v26, %v316_v33 }
 0x337   :  { %473 = vmatmul.mubr.msk.f32.vlgmr.msra.gmra.mrb[2].mxu1 %vm303_vm2, %v317_v34 }
 0x40a   :  { %v387_v35 = vpop.f32.mrb[2].mxu1 }
 0x40b   :  { %391 = vst [vmem:[#allocation7] sm:$0xff] %v387_v35  ;;  %v474_v36 = vpop.f32.mrb[3].mxu1 }
 0x40c   :  { %599 = shalt.err (!%p596_p6)
}
 0x40d   :  { %s600_s10 = scalar_lea.hbm %s697_s2, 128 }
 0x40e   :  { %p601_p7 = scmp.ne.s32.totalorder %s697_s2, %s600_s10  ;;  %p604_p8 = scmp.lt.u32.totalorder %s600_s10, %s697_s2 }
 0x410   :  { %p606_p9 = pnand %p604_p8, %p601_p7 }
 0x412   :  { %609 = shalt.err (!%p606_p9)
}
 0x413   :  { %401 = dma.vmem_to_hbm [thread:$0]  %s399_s6, 128, %s697_s2, [#allocation4]  }
 0x414   :  { %614 = dma.done.wait [#allocation4], 128  }
 0x415   :  { %615 = vsyncadd [#allocation4], 4294967168 }
 0x416   :  { %405 = vsyncpa [#allocation3], 1 }
 0x417   :  { %406 = vsyncpa [#allocation6], 1 }
 0x418   :  { %407 = vsyncpa [#allocation4], 1 }

</bundles_post_ra>
